<compile_context>
chip_gen: v6e
topology: v6e:2x2x1
jax: 0.10.0
libtpu: 0.0.40
codegen_flags: <defaults>
</compile_context>

<pallas_src>
import jax
import jax.numpy as jnp
from jax.experimental import pallas as pl
from jax.experimental.pallas import tpu as pltpu


def _mlp_kernel(xT_ref,
                w1_ref, b1_ref,
                w2_ref, b2_ref,
                w3_ref, b3_ref,
                w4_ref, b4_ref,
                wf_ref, bf_ref,
                o_ref):
    """Fused 5-layer MLP forward in feature-major layout.

    xT_ref: (in_features, TILE_B)   -- batch on the lane axis
    wN_ref: (out, in) PyTorch layout, bN_ref: (out, 1)
    o_ref : (1, TILE_B)             -- lane-dense output
    """
    xT = xT_ref[...]                              # (in, TILE_B) f32
    in_features = xT.shape[0]

    # ---- Layer 1: K is tiny (2) -> VPU broadcast FMAs, skip the MXU. ----
    w1 = w1_ref[...]                              # (H, in)
    if in_features <= 8:
        acc = w1[:, 0:1] * xT[0:1, :]             # (H,1)*(1,TILE_B) -> (H,TILE_B)
        for k in range(1, in_features):
            acc = acc + w1[:, k:k + 1] * xT[k:k + 1, :]
    else:
        acc = jnp.dot(w1, xT, preferred_element_type=jnp.float32)
    h = jnp.maximum(acc + b1_ref[...], 0.0)       # (H, TILE_B)

    # ---- Layers 2-4: (H,H) @ (H,TILE_B) on the MXU, chained. ----
    for w_ref, b_ref in ((w2_ref, b2_ref), (w3_ref, b3_ref), (w4_ref, b4_ref)):
        z = jnp.dot(w_ref[...], h, preferred_element_type=jnp.float32) + b_ref[...]
        h = jnp.maximum(z, 0.0)

    # ---- Final layer: (1,H) @ (H,TILE_B) -> (1, TILE_B), then sigmoid. ----
    z = jnp.dot(wf_ref[...], h, preferred_element_type=jnp.float32) + bf_ref[...]
    # sigmoid via tanh: runs on the EUP slot, no VALU divide.
    o_ref[...] = 0.5 * jnp.tanh(0.5 * z) + 0.5


def deep_classifier_forward(x, params, *, tile_b=2048):
    """Run the fused Pallas MLP kernel.

    x: (B, in_features) float32
    params: dict with w1..w4, wf of shape (out, in) and b1..b4, bf of shape (out, 1)
    returns: (B, 1) float32 in (0, 1)
    """
    B, in_features = x.shape

    # Lane-dense tiles: multiple of 128. Clamp to the (128-rounded) batch so a
    # tiny batch doesn't run a huge mostly-padding tile, and cap VMEM/live-set
    # growth for very large requested tiles.
    b_round = ((B + 127) // 128) * 128
    tile_b = max(128, min(int(tile_b), b_round))
    tile_b = ((tile_b + 127) // 128) * 128
    num_tiles = pl.cdiv(B, tile_b)
    b_pad = num_tiles * tile_b

    # Feature-major input; pad batch (lane axis) to a multiple of TILE_B.
    xT = x.T.astype(jnp.float32)                  # (in, B)
    if b_pad != B:
        xT = jnp.pad(xT, ((0, 0), (0, b_pad - B)))

    weights = (params["w1"], params["b1"],
               params["w2"], params["b2"],
               params["w3"], params["b3"],
               params["w4"], params["b4"],
               params["wf"], params["bf"])

    def resident_spec(shape):
        # Whole-array VMEM block with a constant index map: DMA'd once,
        # stays resident across all grid steps.
        return pl.BlockSpec(shape, lambda i: (0, 0))

    in_specs = [pl.BlockSpec((in_features, tile_b), lambda i: (0, i))]
    in_specs += [resident_spec(w.shape) for w in weights]

    out = pl.pallas_call(
        _mlp_kernel,
        out_shape=jax.ShapeDtypeStruct((1, b_pad), jnp.float32),
        grid=(num_tiles,),
        in_specs=in_specs,
        out_specs=pl.BlockSpec((1, tile_b), lambda i: (0, i)),
        compiler_params=pltpu.CompilerParams(
            dimension_semantics=("parallel",),    # shard batch tiles across TCs on v7x
        ),
    )(xT, *weights)

    return out[0, :B].reshape(B, 1)


def init_params(key, in_features=2, out_features=40, factor=1.0):
    """Deterministic init mimicking nn.Linear's U(-1/sqrt(fan_in), 1/sqrt(fan_in)),
    with weights divided by `factor` as in the PyTorch module.
    Weights stored in PyTorch layout (out, in); biases as (out, 1)."""
    dims = [(out_features, in_features),
            (out_features, out_features),
            (out_features, out_features),
            (out_features, out_features),
            (1, out_features)]
    names = ["1", "2", "3", "4", "f"]
    params = {}
    for (fan_out, fan_in), name in zip(dims, names):
        key, kw, kb = jax.random.split(key, 3)
        bound = 1.0 / jnp.sqrt(jnp.float32(fan_in))
        w = jax.random.uniform(kw, (fan_out, fan_in), jnp.float32, -bound, bound)
        b = jax.random.uniform(kb, (fan_out, 1), jnp.float32, -bound, bound)
        params["w" + name] = w / factor
        params["b" + name] = b
    return params


def _reference_forward(x, params):
    """Pure-JAX reference for correctness checking (standard batch-major math)."""
    def lin(h, w, b):
        return h @ w.T + b.T
    h = jnp.maximum(lin(x, params["w1"], params["b1"]), 0.0)
    h = jnp.maximum(lin(h, params["w2"], params["b2"]), 0.0)
    h = jnp.maximum(lin(h, params["w3"], params["b3"]), 0.0)
    h = jnp.maximum(lin(h, params["w4"], params["b4"]), 0.0)
    z = lin(h, params["wf"], params["bf"])
    return jax.nn.sigmoid(z)


if __name__ == "__main__":
    key = jax.random.PRNGKey(0)
    key, kx = jax.random.split(key)

    batch = 8
    in_features = 2
    out_features = 40

    x = jax.random.normal(kx, (batch, in_features), jnp.float32)
    params = init_params(key, in_features=in_features,
                         out_features=out_features, factor=1.0)

    out = deep_classifier_forward(x, params, tile_b=256)
    out = jax.block_until_ready(out)

    ref = _reference_forward(x, params)
    assert out.shape == (batch, 1)
    assert jnp.allclose(out, ref, atol=1e-4, rtol=1e-4), "Pallas kernel mismatch vs reference"

    print("KERNEL_OK")
</pallas_src>

<mosaic_0001>
module attributes {stable_mosaic.version = 11 : i64} {
  func.func @_mlp_kernel(%arg0: i32, %arg1: memref<2x128xf32, #tpu.memory_space<vmem>>, %arg2: memref<40x2xf32, #tpu.memory_space<vmem>>, %arg3: memref<40x1xf32, #tpu.memory_space<vmem>>, %arg4: memref<40x40xf32, #tpu.memory_space<vmem>>, %arg5: memref<40x1xf32, #tpu.memory_space<vmem>>, %arg6: memref<40x40xf32, #tpu.memory_space<vmem>>, %arg7: memref<40x1xf32, #tpu.memory_space<vmem>>, %arg8: memref<40x40xf32, #tpu.memory_space<vmem>>, %arg9: memref<40x1xf32, #tpu.memory_space<vmem>>, %arg10: memref<1x40xf32, #tpu.memory_space<vmem>>, %arg11: memref<1x1xf32, #tpu.memory_space<vmem>>, %arg12: memref<1x128xf32, #tpu.memory_space<vmem>>) attributes {dimension_semantics = [#tpu.dimension_semantics<parallel>], iteration_bounds = array<i64: 1>, scalar_prefetch = 0 : i64, scratch_operands = 0 : i64, tpu.core_type = #tpu.core_type<tc>, window_params = [{transform_indices = @transform_0, window_bounds = array<i64: 2, 128>}, {pipeline_mode = #tpu.pipeline_mode<synchronous>, transform_indices = @transform_1, window_bounds = array<i64: 40, 2>}, {pipeline_mode = #tpu.pipeline_mode<synchronous>, transform_indices = @transform_2, window_bounds = array<i64: 40, 1>}, {pipeline_mode = #tpu.pipeline_mode<synchronous>, transform_indices = @transform_3, window_bounds = array<i64: 40, 40>}, {pipeline_mode = #tpu.pipeline_mode<synchronous>, transform_indices = @transform_4, window_bounds = array<i64: 40, 1>}, {pipeline_mode = #tpu.pipeline_mode<synchronous>, transform_indices = @transform_5, window_bounds = array<i64: 40, 40>}, {pipeline_mode = #tpu.pipeline_mode<synchronous>, transform_indices = @transform_6, window_bounds = array<i64: 40, 1>}, {pipeline_mode = #tpu.pipeline_mode<synchronous>, transform_indices = @transform_7, window_bounds = array<i64: 40, 40>}, {pipeline_mode = #tpu.pipeline_mode<synchronous>, transform_indices = @transform_8, window_bounds = array<i64: 40, 1>}, {pipeline_mode = #tpu.pipeline_mode<synchronous>, transform_indices = @transform_9, window_bounds = array<i64: 1, 40>}, {pipeline_mode = #tpu.pipeline_mode<synchronous>, transform_indices = @transform_10, window_bounds = array<i64: 1, 1>}, {transform_indices = @transform_11, window_bounds = array<i64: 1, 128>}]} {
    %c0 = arith.constant 0 : index
    %c0_0 = arith.constant 0 : index
    %0 = vector.load %arg1[%c0, %c0_0] : memref<2x128xf32, #tpu.memory_space<vmem>>, vector<2x128xf32>
    %c0_1 = arith.constant 0 : index
    %c0_2 = arith.constant 0 : index
    %1 = vector.load %arg2[%c0_1, %c0_2] : memref<40x2xf32, #tpu.memory_space<vmem>>, vector<40x2xf32>
    %2 = vector.extract_strided_slice %1 {offsets = [0, 0], sizes = [40, 1], strides = [1, 1]} : vector<40x2xf32> to vector<40x1xf32>
    %3 = vector.extract_strided_slice %0 {offsets = [0, 0], sizes = [1, 128], strides = [1, 1]} : vector<2x128xf32> to vector<1x128xf32>
    %4 = vector.broadcast %2 : vector<40x1xf32> to vector<40x128xf32>
    %5 = vector.broadcast %3 : vector<1x128xf32> to vector<40x128xf32>
    %6 = arith.mulf %4, %5 : vector<40x128xf32>
    %7 = vector.extract_strided_slice %1 {offsets = [0, 1], sizes = [40, 1], strides = [1, 1]} : vector<40x2xf32> to vector<40x1xf32>
    %8 = vector.extract_strided_slice %0 {offsets = [1, 0], sizes = [1, 128], strides = [1, 1]} : vector<2x128xf32> to vector<1x128xf32>
    %9 = vector.broadcast %7 : vector<40x1xf32> to vector<40x128xf32>
    %10 = vector.broadcast %8 : vector<1x128xf32> to vector<40x128xf32>
    %11 = arith.mulf %9, %10 : vector<40x128xf32>
    %12 = arith.addf %6, %11 : vector<40x128xf32>
    %c0_3 = arith.constant 0 : index
    %c0_4 = arith.constant 0 : index
    %13 = vector.load %arg3[%c0_3, %c0_4] : memref<40x1xf32, #tpu.memory_space<vmem>>, vector<40x1xf32>
    %14 = vector.broadcast %13 : vector<40x1xf32> to vector<40x128xf32>
    %15 = arith.addf %12, %14 : vector<40x128xf32>
    %cst = arith.constant 0.000000e+00 : f32
    %16 = vector.broadcast %cst : f32 to vector<40x128xf32>
    %17 = arith.maximumf %15, %16 : vector<40x128xf32>
    %c0_5 = arith.constant 0 : index
    %c0_6 = arith.constant 0 : index
    %18 = vector.load %arg4[%c0_5, %c0_6] : memref<40x40xf32, #tpu.memory_space<vmem>>, vector<40x40xf32>
    %cst_7 = arith.constant dense<0.000000e+00> : vector<40x128xf32>
    %19 = tpu.matmul %18, %17, %cst_7 {dimension_numbers = #tpu.dot_dimension_numbers<[1], [0], [0], [1], [0, 0, 1, 1], [], []>} : vector<40x40xf32>, vector<40x128xf32>, vector<40x128xf32> -> vector<40x128xf32>
    %c0_8 = arith.constant 0 : index
    %c0_9 = arith.constant 0 : index
    %20 = vector.load %arg5[%c0_8, %c0_9] : memref<40x1xf32, #tpu.memory_space<vmem>>, vector<40x1xf32>
    %21 = vector.broadcast %20 : vector<40x1xf32> to vector<40x128xf32>
    %22 = arith.addf %19, %21 : vector<40x128xf32>
    %cst_10 = arith.constant 0.000000e+00 : f32
    %23 = vector.broadcast %cst_10 : f32 to vector<40x128xf32>
    %24 = arith.maximumf %22, %23 : vector<40x128xf32>
    %c0_11 = arith.constant 0 : index
    %c0_12 = arith.constant 0 : index
    %25 = vector.load %arg6[%c0_11, %c0_12] : memref<40x40xf32, #tpu.memory_space<vmem>>, vector<40x40xf32>
    %cst_13 = arith.constant dense<0.000000e+00> : vector<40x128xf32>
    %26 = tpu.matmul %25, %24, %cst_13 {dimension_numbers = #tpu.dot_dimension_numbers<[1], [0], [0], [1], [0, 0, 1, 1], [], []>} : vector<40x40xf32>, vector<40x128xf32>, vector<40x128xf32> -> vector<40x128xf32>
    %c0_14 = arith.constant 0 : index
    %c0_15 = arith.constant 0 : index
    %27 = vector.load %arg7[%c0_14, %c0_15] : memref<40x1xf32, #tpu.memory_space<vmem>>, vector<40x1xf32>
    %28 = vector.broadcast %27 : vector<40x1xf32> to vector<40x128xf32>
    %29 = arith.addf %26, %28 : vector<40x128xf32>
    %cst_16 = arith.constant 0.000000e+00 : f32
    %30 = vector.broadcast %cst_16 : f32 to vector<40x128xf32>
    %31 = arith.maximumf %29, %30 : vector<40x128xf32>
    %c0_17 = arith.constant 0 : index
    %c0_18 = arith.constant 0 : index
    %32 = vector.load %arg8[%c0_17, %c0_18] : memref<40x40xf32, #tpu.memory_space<vmem>>, vector<40x40xf32>
    %cst_19 = arith.constant dense<0.000000e+00> : vector<40x128xf32>
    %33 = tpu.matmul %32, %31, %cst_19 {dimension_numbers = #tpu.dot_dimension_numbers<[1], [0], [0], [1], [0, 0, 1, 1], [], []>} : vector<40x40xf32>, vector<40x128xf32>, vector<40x128xf32> -> vector<40x128xf32>
    %c0_20 = arith.constant 0 : index
    %c0_21 = arith.constant 0 : index
    %34 = vector.load %arg9[%c0_20, %c0_21] : memref<40x1xf32, #tpu.memory_space<vmem>>, vector<40x1xf32>
    %35 = vector.broadcast %34 : vector<40x1xf32> to vector<40x128xf32>
    %36 = arith.addf %33, %35 : vector<40x128xf32>
    %cst_22 = arith.constant 0.000000e+00 : f32
    %37 = vector.broadcast %cst_22 : f32 to vector<40x128xf32>
    %38 = arith.maximumf %36, %37 : vector<40x128xf32>
    %c0_23 = arith.constant 0 : index
    %c0_24 = arith.constant 0 : index
    %39 = vector.load %arg10[%c0_23, %c0_24] : memref<1x40xf32, #tpu.memory_space<vmem>>, vector<1x40xf32>
    %cst_25 = arith.constant dense<0.000000e+00> : vector<1x128xf32>
    %40 = tpu.matmul %39, %38, %cst_25 {dimension_numbers = #tpu.dot_dimension_numbers<[1], [0], [0], [1], [0, 0, 1, 1], [], []>} : vector<1x40xf32>, vector<40x128xf32>, vector<1x128xf32> -> vector<1x128xf32>
    %c0_26 = arith.constant 0 : index
    %c0_27 = arith.constant 0 : index
    %41 = vector.load %arg11[%c0_26, %c0_27] : memref<1x1xf32, #tpu.memory_space<vmem>>, vector<1x1xf32>
    %42 = vector.broadcast %41 : vector<1x1xf32> to vector<1x128xf32>
    %43 = arith.addf %40, %42 : vector<1x128xf32>
    %cst_28 = arith.constant 5.000000e-01 : f32
    %44 = vector.broadcast %cst_28 : f32 to vector<1x128xf32>
    %45 = arith.mulf %44, %43 : vector<1x128xf32>
    %46 = math.tanh %45 : vector<1x128xf32>
    %cst_29 = arith.constant 5.000000e-01 : f32
    %47 = vector.broadcast %cst_29 : f32 to vector<1x128xf32>
    %48 = arith.mulf %47, %46 : vector<1x128xf32>
    %cst_30 = arith.constant 5.000000e-01 : f32
    %49 = vector.broadcast %cst_30 : f32 to vector<1x128xf32>
    %50 = arith.addf %48, %49 : vector<1x128xf32>
    %c0_31 = arith.constant 0 : index
    %c0_32 = arith.constant 0 : index
    %51 = vector.load %arg12[%c0_31, %c0_32] : memref<1x128xf32, #tpu.memory_space<vmem>>, vector<1x128xf32>
    tpu.vector_store %arg12[%c0_31, %c0_32], %50 {strides = array<i32>} : memref<1x128xf32, #tpu.memory_space<vmem>>, vector<1x128xf32>,
    return
  }
  func.func @transform_0(%arg0: i32) -> (i32, i32) {
    %c0_i32 = arith.constant 0 : i32
    %c0_i32_0 = arith.constant 0 : i32
    return %c0_i32, %arg0 : i32, i32
  }
  func.func @transform_1(%arg0: i32) -> (i32, i32) {
    %c0_i32 = arith.constant 0 : i32
    %c0_i32_0 = arith.constant 0 : i32
    %c0_i32_1 = arith.constant 0 : i32
    return %c0_i32, %c0_i32_0 : i32, i32
  }
  func.func @transform_2(%arg0: i32) -> (i32, i32) {
    %c0_i32 = arith.constant 0 : i32
    %c0_i32_0 = arith.constant 0 : i32
    %c0_i32_1 = arith.constant 0 : i32
    return %c0_i32, %c0_i32_0 : i32, i32
  }
  func.func @transform_3(%arg0: i32) -> (i32, i32) {
    %c0_i32 = arith.constant 0 : i32
    %c0_i32_0 = arith.constant 0 : i32
    %c0_i32_1 = arith.constant 0 : i32
    return %c0_i32, %c0_i32_0 : i32, i32
  }
  func.func @transform_4(%arg0: i32) -> (i32, i32) {
    %c0_i32 = arith.constant 0 : i32
    %c0_i32_0 = arith.constant 0 : i32
    %c0_i32_1 = arith.constant 0 : i32
    return %c0_i32, %c0_i32_0 : i32, i32
  }
  func.func @transform_5(%arg0: i32) -> (i32, i32) {
    %c0_i32 = arith.constant 0 : i32
    %c0_i32_0 = arith.constant 0 : i32
    %c0_i32_1 = arith.constant 0 : i32
    return %c0_i32, %c0_i32_0 : i32, i32
  }
  func.func @transform_6(%arg0: i32) -> (i32, i32) {
    %c0_i32 = arith.constant 0 : i32
    %c0_i32_0 = arith.constant 0 : i32
    %c0_i32_1 = arith.constant 0 : i32
    return %c0_i32, %c0_i32_0 : i32, i32
  }
  func.func @transform_7(%arg0: i32) -> (i32, i32) {
    %c0_i32 = arith.constant 0 : i32
    %c0_i32_0 = arith.constant 0 : i32
    %c0_i32_1 = arith.constant 0 : i32
    return %c0_i32, %c0_i32_0 : i32, i32
  }
  func.func @transform_8(%arg0: i32) -> (i32, i32) {
    %c0_i32 = arith.constant 0 : i32
    %c0_i32_0 = arith.constant 0 : i32
    %c0_i32_1 = arith.constant 0 : i32
    return %c0_i32, %c0_i32_0 : i32, i32
  }
  func.func @transform_9(%arg0: i32) -> (i32, i32) {
    %c0_i32 = arith.constant 0 : i32
    %c0_i32_0 = arith.constant 0 : i32
    %c0_i32_1 = arith.constant 0 : i32
    return %c0_i32, %c0_i32_0 : i32, i32
  }
  func.func @transform_10(%arg0: i32) -> (i32, i32) {
    %c0_i32 = arith.constant 0 : i32
    %c0_i32_0 = arith.constant 0 : i32
    %c0_i32_1 = arith.constant 0 : i32
    return %c0_i32, %c0_i32_0 : i32, i32
  }
  func.func @transform_11(%arg0: i32) -> (i32, i32) {
    %c0_i32 = arith.constant 0 : i32
    %c0_i32_0 = arith.constant 0 : i32
    return %c0_i32, %arg0 : i32, i32
  }
}

</mosaic_0001>

<bundles_post_ra>
// kernel: tpu_custom_call.1
= control target key start
LH: loop header
LB: loop body
LE: loop exit
PB: predicated region body
PF: predicated region fallthrough
CT: control target
= control target key end

     0   :  { %s1160_s0 = inlined_call_operand.vmem [shape: f32[2,128], index: 0, kind: input, shape index: {}]   ;;  %s1161_s1 = inlined_call_operand.vmem [shape: f32[40,2], index: 1, kind: input, shape index: {}]   ;;  %s1162_s2 = inlined_call_operand.vmem [shape: f32[40,1], index: 2, kind: input, shape index: {}]   ;;  %s1163_s3 = inlined_call_operand.vmem [shape: f32[40,40], index: 3, kind: input, shape index: {}]   ;;  %s1164_s4 = inlined_call_operand.vmem [shape: f32[40,1], index: 4, kind: input, shape index: {}]   ;;  %s1165_s5 = inlined_call_operand.vmem [shape: f32[40,40], index: 5, kind: input, shape index: {}]   ;;  %s1166_s6 = inlined_call_operand.vmem [shape: f32[40,1], index: 6, kind: input, shape index: {}]   ;;  %s1167_s7 = inlined_call_operand.vmem [shape: f32[40,40], index: 7, kind: input, shape index: {}]   ;;  %s1168_s8 = inlined_call_operand.vmem [shape: f32[40,1], index: 8, kind: input, shape index: {}]   ;;  %s1169_s9 = inlined_call_operand.vmem [shape: f32[1,40], index: 9, kind: input, shape index: {}]   ;;  %s1170_s10 = inlined_call_operand.<no memory space> [shape: f32[1,1], index: 10, kind: input, shape index: {}]   ;;  %s1171_s11 = inlined_call_operand.hbm [shape: f32[1,128], index: 11, kind: output, shape index: {}]  }
   0x1   :  { %v16_v0 = vstv %s1170_s10 }
   0x2   :  { %17 = vst [vmem:[#allocation2] sm:$0x1] %v16_v0 }
   0x3   :  { %v46_v1 = vld [vmem:[%s1161_s1 + $0x20] sm:$0xff]  ;;  %v45_v2 = vld [vmem:[%s1161_s1 + $0x18] sm:$0xff]  ;;  %v882_v3 = vmov 1   ;;  %v883_v4 = vmov 0   ;;  %v44_v5 = vld [vmem:[%s1161_s1 + $0x10] sm:$0xff] }
   0x4   :  { %849 = vset.pattern.permute.xlu0 %v882_v3  ;;  %850 = vset.pattern.permute.xlu1 %v883_v4 }
   0x5   :  { %98 = vperm.xlu0 %849, %v46_v1   ;;  %64 = vperm.xlu1 %850, %v45_v2  }
   0x9   :  { %851 = vset.pattern.permute.xlu1 %v882_v3  ;;  %90 = vperm.xlu0 %849, %v44_v5  }
   0xa   :  { %94 = vperm.xlu1 %851, %v45_v2  }
   0xb   :  { %18 = vsyncpa [#allocation4], 0  ;;  %v43_v6 = vld [vmem:[%s1161_s1 + $0x8] sm:$0xff]  ;;  %v119_v7 = vld [vmem:[%s1162_s2 + $0x20] sm:$0xff]  ;;  %v884_v8 = vmov 0.0   ;;  %vm885_vm0 = vmmov 0   ;;  %v72_v30 = vlaneseq }
   0xc   :  { %746 = vmatprep.subr.mxu0 %v884_v8  ;;  %v42_v9 = vld [vmem:[%s1161_s1] sm:$0xff]  ;;  %834 = vmatprep.subr.mxu1 %v884_v8  ;;  %v117_v10 = vld [vmem:[%s1162_s2 + $0x10] sm:$0xff]  ;;  %v118_v11 = vld [vmem:[%s1162_s2 + $0x18] sm:$0xff]  ;;  %vm190_vm1 = vcmask 326656   ;;  %s886_s25 = smov [#allocation3]  }
   0xd   :  { %853 = vset.pattern.permute.xlu0 %v883_v4  ;;  %v115_v12 = vld [vmem:[%s1162_s2] sm:$0xff]  ;;  %v163_v13 = vld [vmem:[%s1164_s4 + $0x18] sm:$0xff]  ;;  %v161_v14 = vld [vmem:[%s1164_s4 + $0x8] sm:$0xff]  ;;  %756 = vmatprep.mubr.msk.f32.mxu0 %vm885_vm0, %v884_v8  ;;  %v1031_v31 = vshrl.u32 %v72_v30, 7  ;;  %s686_s26 = sshll.u32 %s886_s25, 4  ;;  %s687_s26 = int_to_ptr.vmem [resolvable:$true] %s686_s26 }
   0xe   :  { %852 = vset.pattern.permute.xlu1 %v883_v4  ;;  %69 = vperm.xlu0 %853, %v46_v1   ;;  %v116_v15 = vld [vmem:[%s1162_s2 + $0x8] sm:$0xff]  ;;  %v310_v16 = vld [vmem:[%s1166_s6 + $0x20] sm:$0xff]  ;;  %v308_v18 = vld [vmem:[%s1166_s6 + $0x10] sm:$0xff]  ;;  %s864_s27 = scalar_lea.vmem %s687_s26, 32  ;;  %p865_p1 = scmp.lt.s32.totalorder %s687_s26, %s687_s26 }
   0xf   :  { %59 = vperm.xlu1 %852, %v44_v5   ;;  %v164_v17 = vld [vmem:[%s1164_s4 + $0x20] sm:$0xff]  ;;  %765 = vmatprep.mubr.msk.f32.mxu1 %vm885_vm0, %v884_v8  ;;  %v162_v19 = vld [vmem:[%s1164_s4 + $0x10] sm:$0xff]  ;;  %v454_v22 = vld [vmem:[%s1168_s8 + $0x18] sm:$0xff]  ;;  %v103_v34 = vsub.s32 1, %v1031_v31  ;;  %v74_v35 = vsub.s32 0, %v1031_v31 }
  0x10   :  { %v306_v20 = vld [vmem:[%s1166_s6] sm:$0xff]  ;;  %v309_v23 = vld [vmem:[%s1166_s6 + $0x18] sm:$0xff]  ;;  %v452_v24 = vld [vmem:[%s1168_s8 + $0x8] sm:$0xff] }
  0x11   :  { %v160_v21 = vld [vmem:[%s1164_s4] sm:$0xff]  ;;  %v307_v25 = vld [vmem:[%s1166_s6 + $0x8] sm:$0xff]  ;;  %v453_v28 = vld [vmem:[%s1168_s8 + $0x10] sm:$0xff] }
  0x12   :  { %54 = vperm.xlu0 %853, %v43_v6   ;;  %v592_v26 = vld [vmem:[#allocation2] sm:$0x1] }
  0x13   :  { %142 = vperm.xlu1 %852, %v119_v7   ;;  %v455_v27 = vld [vmem:[%s1168_s8 + $0x20] sm:$0xff] }
  0x14   :  { %v451_v29 = vld [vmem:[%s1168_s8] sm:$0xff] }
  0x15   :  { %v41_v37 = vld [vmem:[%s1160_s0] sm:$0x3] }
  0x16   :  { %49 = vperm.xlu0 %853, %v42_v9   ;;  %v104_v39 = vrot.slane %v41_v37, %v103_v34  ;;  %v75_v40 = vrot.slane %v41_v37, %v74_v35 }
  0x17   :  { %854 = vset.pattern.permute.xlu1 %v882_v3 }
  0x18   :  { %86 = vperm.xlu1 %854, %v43_v6  }
  0x1a   :  { %132 = vperm.xlu0 %853, %v117_v10  }
  0x1c   :  { %855 = vset.pattern.permute.xlu1 %v883_v4 }
  0x1d   :  { %137 = vperm.xlu1 %855, %v118_v11  }
  0x1e   :  { %122 = vperm.xlu0 %853, %v115_v12  }
  0x21   :  { %856 = vset.pattern.permute.xlu1 %v882_v3 }
  0x22   :  { %82 = vperm.xlu1 %856, %v42_v9   ;;  %182 = vperm.xlu0 %853, %v163_v13  }
  0x26   :  { %857 = vset.pattern.permute.xlu1 %v883_v4  ;;  %172 = vperm.xlu0 %853, %v161_v14   ;;  %v155_v14 = vld [vmem:[%s1163_s3] sm:$0xff] }
  0x27   :  { %127 = vperm.xlu1 %857, %v116_v15   ;;  %v158_v15 = vld [vmem:[%s1163_s3 + $0x18] sm:$0xff] }
  0x2a   :  { %333 = vperm.xlu0 %853, %v310_v16   ;;  %v156_v16 = vld [vmem:[%s1163_s3 + $0x8] sm:$0xff] }
  0x2b   :  { %187 = vperm.xlu1 %857, %v164_v17   ;;  %v159_v17 = vld [vmem:[%s1163_s3 + $0x20] sm:$0xff] }
  0x2e   :  { %323 = vperm.xlu0 %853, %v308_v18   ;;  %v157_v18 = vld [vmem:[%s1163_s3 + $0x10] sm:$0xff] }
  0x2f   :  { %177 = vperm.xlu1 %857, %v162_v19  }
  0x32   :  { %313 = vperm.xlu0 %853, %v306_v20  }
  0x33   :  { %167 = vperm.xlu1 %857, %v160_v21  }
  0x36   :  { %473 = vperm.xlu0 %853, %v454_v22  }
  0x37   :  { %328 = vperm.xlu1 %857, %v309_v23  }
  0x3a   :  { %463 = vperm.xlu0 %853, %v452_v24  }
  0x3b   :  { %318 = vperm.xlu1 %857, %v307_v25  }
  0x3e   :  { %595 = vperm.xlu0 %853, %v592_v26  }
  0x3f   :  { %478 = vperm.xlu1 %857, %v455_v27  }
  0x43   :  { %468 = vperm.xlu1 %857, %v453_v28  }
  0x47   :  { %458 = vperm.xlu1 %857, %v451_v29  }
  0x80   :  { %v65_v32 = vpop.permute.xlu1 %64  ;;  %v99_v33 = vpop.permute.xlu0 %98 }
  0x81   :  { %v109_v41 = vmul.f32 %v104_v39, %v99_v33  ;;  %v79_v55 = vmul.f32 %v75_v40, %v65_v32 }
  0x84   :  { %v91_v36 = vpop.permute.xlu0 %90 }
  0x85   :  { %v95_v38 = vpop.permute.xlu1 %94  ;;  %v107_v52 = vmul.f32 %v104_v39, %v91_v36 }
  0x86   :  { %v108_v51 = vmul.f32 %v104_v39, %v95_v38 }
  0x88   :  { %v113_v58 = vadd.f32 %v108_v51, %v79_v55 }
  0x89   :  { %v70_v42 = vpop.permute.xlu0 %69 }
  0x8a   :  { %v80_v43 = vmul.f32 %v75_v40, %v70_v42  ;;  %v60_v44 = vpop.permute.xlu1 %59 }
  0x8b   :  { %v78_v53 = vmul.f32 %v75_v40, %v60_v44 }
  0x8c   :  { %v114_v45 = vadd.f32 %v109_v41, %v80_v43 }
  0x8d   :  { %v55_v46 = vpop.permute.xlu0 %54  ;;  %v112_v57 = vadd.f32 %v107_v52, %v78_v53 }
  0x8e   :  { %v143_v47 = vpop.permute.xlu1 %142  ;;  %v77_v63 = vmul.f32 %v75_v40, %v55_v46  ;;  %v301_v46 = vld [vmem:[%s1165_s5] sm:$0xff] }
  0x8f   :  { %v149_v48 = vadd.f32 %v143_v47, %v114_v45  ;;  %v302_v47 = vld [vmem:[%s1165_s5 + $0x8] sm:$0xff] }
  0x91   :  { %v154_v49 = vmax.f32 %v149_v48, 0.0  ;;  %v50_v50 = vpop.permute.xlu0 %49  ;;  %v303_v48 = vld [vmem:[%s1165_s5 + $0x10] sm:$0xff] }
  0x92   :  { %v76_v3 = vmul.f32 %v75_v40, %v50_v50  ;;  %v305_v50 = vld [vmem:[%s1165_s5 + $0x20] sm:$0xff] }
  0x93   :  { %v87_v54 = vpop.permute.xlu1 %86  ;;  %747 = vmatpush3.msra.mxu0 %v154_v49  ;;  %839 = vmatpush3.msra.mxu1 %v154_v49  ;;  %v304_v49 = vld [vmem:[%s1165_s5 + $0x18] sm:$0xff] }
  0x94   :  { %748 = vmatprep.subr.mxu0 %v884_v8  ;;  %835 = vmatprep.subr.mxu1 %v884_v8  ;;  %v106_v0 = vmul.f32 %v104_v39, %v87_v54 }
  0x95   :  { %v133_v56 = vpop.permute.xlu0 %132 }
  0x96   :  { %v147_v60 = vadd.f32 %v133_v56, %v112_v57  ;;  %v111_v6 = vadd.f32 %v106_v0, %v77_v63 }
  0x98   :  { %v138_v59 = vpop.permute.xlu1 %137  ;;  %v152_v1 = vmax.f32 %v147_v60, 0.0 }
  0x99   :  { %v148_v61 = vadd.f32 %v138_v59, %v113_v58  ;;  %v123_v7 = vpop.permute.xlu0 %122 }
  0x9b   :  { %v153_v62 = vmax.f32 %v148_v61, 0.0 }
  0x9d   :  { %v83_v2 = vpop.permute.xlu1 %82  ;;  %749 = vmatpush3.msra.mxu0 %v153_v62  ;;  %840 = vmatpush3.msra.mxu1 %v153_v62  ;;  %v183_v22 = vpop.permute.xlu0 %182 }
  0x9e   :  { %v105_v4 = vmul.f32 %v104_v39, %v83_v2  ;;  %750 = vmatprep.subr.mxu0 %v884_v8  ;;  %836 = vmatprep.subr.mxu1 %v884_v8 }
  0x9f   :  { %751 = vmatpush3.msra.mxu0 %v152_v1  ;;  %841 = vmatpush3.msra.mxu1 %v152_v1 }
  0xa0   :  { %v110_v5 = vadd.f32 %v105_v4, %v76_v3  ;;  %752 = vmatprep.subr.mxu0 %v884_v8  ;;  %837 = vmatprep.subr.mxu1 %v884_v8 }
  0xa1   :  { %v173_v34 = vpop.permute.xlu0 %172 }
  0xa2   :  { %v128_v9 = vpop.permute.xlu1 %127  ;;  %v145_v11 = vadd.f32 %v123_v7, %v110_v5 }
  0xa3   :  { %v146_v10 = vadd.f32 %v128_v9, %v111_v6 }
  0xa4   :  { %v150_v13 = vmax.f32 %v145_v11, 0.0 }
  0xa5   :  { %v151_v12 = vmax.f32 %v146_v10, 0.0  ;;  %v334_v56 = vpop.permute.xlu0 %333 }
  0xa6   :  { %v188_v19 = vpop.permute.xlu1 %187 }
  0xa7   :  { %753 = vmatpush3.msra.mxu0 %v151_v12  ;;  %842 = vmatpush3.msra.mxu1 %v151_v12 }
  0xa8   :  { %754 = vmatprep.subr.mxu0 %v884_v8  ;;  %838 = vmatprep.subr.mxu1 %v884_v8 }
  0xa9   :  { %755 = vmatpush3.msra.mxu0 %v150_v13  ;;  %843 = vmatpush3.msra.mxu1 %v150_v13  ;;  %v324_v61 = vpop.permute.xlu0 %323  ;;  %v446_v13 = vld [vmem:[%s1167_s7] sm:$0xff] }
  0xaa   :  { %757 = vmatmul.mubr.msk.f32.vlgmr.msra.gmra.mxu0 %vm190_vm1, %v155_v14  ;;  %766 = vmatmul.mubr.msk.f32.vlgmr.msra.gmra.mxu1 %vm190_vm1, %v158_v15  ;;  %v178_v25 = vpop.permute.xlu1 %177  ;;  %v447_v14 = vld [vmem:[%s1167_s7 + $0x8] sm:$0xff]  ;;  %v448_v15 = vld [vmem:[%s1167_s7 + $0x10] sm:$0xff] }
  0xab   :  { %759 = vmatprep.mubr.msk.f32.mxu0 %vm885_vm0, %v884_v8  ;;  %768 = vmatprep.mubr.msk.f32.mxu1 %vm885_vm0, %v884_v8 }
  0xac   :  { %771 = vmatprep.subr.mxu1 %v884_v8  ;;  %796 = vmatprep.subr.mxu0 %v884_v8 }
  0xad   :  { %v314_v7 = vpop.permute.xlu0 %313 }
  0xae   :  { %760 = vmatmul.mubr.msk.f32.gmra.mxu0 %vm190_vm1, %v156_v16  ;;  %769 = vmatmul.mubr.msk.f32.gmra.mxu1 %vm190_vm1, %v159_v17  ;;  %v168_v40 = vpop.permute.xlu1 %167  ;;  %v449_v16 = vld [vmem:[%s1167_s7 + $0x18] sm:$0xff]  ;;  %v450_v17 = vld [vmem:[%s1167_s7 + $0x20] sm:$0xff] }
  0xaf   :  { %762 = vmatprep.mubr.msk.f32.mxu0 %vm885_vm0, %v884_v8  ;;  %781 = vmatprep.mubr.msk.f32.mxu1 %vm885_vm0, %v884_v8 }
  0xb2   :  { %763 = vmatmul.mubr.msk.f32.gmra.mxu0 %vm190_vm1, %v157_v18  ;;  %v329_v59 = vpop.permute.xlu1 %328 }
  0xb3   :  { %806 = vmatprep.mubr.msk.f32.mxu0 %vm885_vm0, %v884_v8 }
  0xb6   :  { %v319_v4 = vpop.permute.xlu1 %318 }
 0x16a   :  { %v272_v20 = vpop.f32.mrf.mxu0  ;;  %v287_v21 = vpop.f32.mrf.mxu1 }
 0x16b   :  { %v288_v28 = vadd.f32 %v287_v21, %v183_v22  ;;  %v273_v42 = vadd.f32 %v272_v20, %v168_v40 }
 0x16c   :  { %v758_v23 = vpop.f32.mrf.mxu0  ;;  %v767_v24 = vpop.f32.mrf.mxu1 }
 0x16d   :  { %v299_v37 = vmax.f32 %v288_v28, 0.0  ;;  %v296_v45 = vmax.f32 %v273_v42, 0.0  ;;  %v479_v23 = vpop.permute.xlu1 %478 }
 0x16e   :  { %v277_v26 = vpop.f32.mrf.mxu0  ;;  %v292_v27 = vpop.f32.mrf.mxu1 }
 0x16f   :  { %v293_v29 = vadd.f32 %v292_v27, %v188_v19  ;;  %v278_v38 = vadd.f32 %v277_v26, %v173_v34  ;;  %v474_v26 = vpop.permute.xlu0 %473 }
 0x170   :  { %v761_v30 = vpop.f32.mrf.mxu0  ;;  %v770_v32 = vpop.f32.mrf.mxu1 }
 0x171   :  { %v300_v33 = vmax.f32 %v293_v29, 0.0  ;;  %v297_v44 = vmax.f32 %v278_v38, 0.0  ;;  %v469_v28 = vpop.permute.xlu1 %468 }
 0x172   :  { %v282_v36 = vpop.f32.mrf.mxu0 }
 0x173   :  { %v283_v39 = vadd.f32 %v282_v36, %v178_v25  ;;  %772 = vmatpush3.msra.mxu1 %v300_v33 }
 0x174   :  { %v764_v41 = vpop.f32.mrf.mxu0  ;;  %773 = vmatprep.subr.mxu1 %v884_v8 }
 0x175   :  { %v298_v43 = vmax.f32 %v283_v39, 0.0  ;;  %774 = vmatpush3.msra.mxu1 %v299_v37  ;;  %v464_v37 = vpop.permute.xlu0 %463  ;;  %v459_v40 = vpop.permute.xlu1 %458 }
 0x176   :  { %775 = vmatprep.subr.mxu1 %v884_v8 }
 0x177   :  { %776 = vmatpush3.msra.mxu1 %v298_v43 }
 0x178   :  { %777 = vmatprep.subr.mxu1 %v884_v8 }
 0x179   :  { %778 = vmatpush3.msra.mxu1 %v297_v44 }
 0x17a   :  { %779 = vmatprep.subr.mxu1 %v884_v8 }
 0x17b   :  { %780 = vmatpush3.msra.mxu1 %v296_v45  ;;  %v591_v45 = vld [vmem:[%s1169_s9] sm:$0x1]  ;;  %s860_s9 = scalar_lea.vmem %s687_s26, 16 }
 0x17c   :  { %782 = vmatmul.mubr.msk.f32.vlgmr.msra.gmra.mxu1 %vm190_vm1, %v301_v46  ;;  %821 = vmatprep.subr.mxu1 %v884_v8  ;;  %v596_v46 = vpop.permute.xlu0 %595  ;;  %p861_p0 = scmp.ne.s32.totalorder %s687_s26, %s860_s9  ;;  %p866_p2 = scmp.lt.s32.totalorder %s864_s27, %s860_s9 }
 0x17d   :  { %784 = vmatprep.mubr.msk.f32.mxu1 %vm885_vm0, %v884_v8 }
 0x17e   :  { %p867_p3 = por %p866_p2, %p865_p1 }
 0x180   :  { %785 = vmatmul.mubr.msk.f32.gmra.mxu1 %vm190_vm1, %v302_v47  ;;  %v601_v47 = vrot.slane %v596_v46, %v74_v35  ;;  %p868_p4 = pnand %p867_p3, %p861_p0 }
 0x181   :  { %787 = vmatprep.mubr.msk.f32.mxu1 %vm885_vm0, %v884_v8 }
 0x184   :  { %788 = vmatmul.mubr.msk.f32.gmra.mxu1 %vm190_vm1, %v303_v48 }
 0x185   :  { %790 = vmatprep.mubr.msk.f32.mxu1 %vm885_vm0, %v884_v8 }
 0x188   :  { %791 = vmatmul.mubr.msk.f32.gmra.mxu1 %vm190_vm1, %v304_v49 }
 0x189   :  { %793 = vmatprep.mubr.msk.f32.mxu1 %vm885_vm0, %v884_v8 }
 0x18c   :  { %794 = vmatmul.mubr.msk.f32.gmra.mxu1 %vm190_vm1, %v305_v50 }
 0x18d   :  { %831 = vmatprep.mubr.msk.f32.mxu1 %vm885_vm0, %v884_v8 }
 0x23c   :  { %v417_v51 = vpop.f32.mrf.mxu1 }
 0x23d   :  { %v418_v9 = vadd.f32 %v417_v51, %v314_v7 }
 0x23e   :  { %v783_v52 = vpop.f32.mrf.mxu1 }
 0x23f   :  { %v441_v12 = vmax.f32 %v418_v9, 0.0 }
 0x240   :  { %v422_v53 = vpop.f32.mrf.mxu1 }
 0x241   :  { %v423_v5 = vadd.f32 %v422_v53, %v319_v4 }
 0x242   :  { %v786_v54 = vpop.f32.mrf.mxu1 }
 0x243   :  { %v442_v11 = vmax.f32 %v423_v5, 0.0 }
 0x244   :  { %v427_v55 = vpop.f32.mrf.mxu1 }
 0x245   :  { %v428_v2 = vadd.f32 %v427_v55, %v324_v61 }
 0x246   :  { %v789_v57 = vpop.f32.mrf.mxu1 }
 0x247   :  { %v443_v10 = vmax.f32 %v428_v2, 0.0 }
 0x248   :  { %v432_v58 = vpop.f32.mrf.mxu1 }
 0x249   :  { %v433_v63 = vadd.f32 %v432_v58, %v329_v59 }
 0x24a   :  { %v792_v60 = vpop.f32.mrf.mxu1 }
 0x24b   :  { %v444_v6 = vmax.f32 %v433_v63, 0.0 }
 0x24c   :  { %v437_v62 = vpop.f32.mrf.mxu1 }
 0x24d   :  { %v438_v0 = vadd.f32 %v437_v62, %v334_v56 }
 0x24e   :  { %v795_v1 = vpop.f32.mrf.mxu1 }
 0x24f   :  { %v445_v3 = vmax.f32 %v438_v0, 0.0 }
 0x251   :  { %797 = vmatpush3.msra.mxu0 %v445_v3 }
 0x252   :  { %798 = vmatprep.subr.mxu0 %v884_v8 }
 0x253   :  { %799 = vmatpush3.msra.mxu0 %v444_v6 }
 0x254   :  { %800 = vmatprep.subr.mxu0 %v884_v8 }
 0x255   :  { %801 = vmatpush3.msra.mxu0 %v443_v10 }
 0x256   :  { %802 = vmatprep.subr.mxu0 %v884_v8 }
 0x257   :  { %803 = vmatpush3.msra.mxu0 %v442_v11 }
 0x258   :  { %804 = vmatprep.subr.mxu0 %v884_v8 }
 0x259   :  { %805 = vmatpush3.msra.mxu0 %v441_v12 }
 0x25a   :  { %807 = vmatmul.mubr.msk.f32.vlgmr.msra.gmra.mxu0 %vm190_vm1, %v446_v13 }
 0x25b   :  { %809 = vmatprep.mubr.msk.f32.mxu0 %vm885_vm0, %v884_v8 }
 0x25e   :  { %810 = vmatmul.mubr.msk.f32.gmra.mxu0 %vm190_vm1, %v447_v14 }
 0x25f   :  { %812 = vmatprep.mubr.msk.f32.mxu0 %vm885_vm0, %v884_v8 }
 0x262   :  { %813 = vmatmul.mubr.msk.f32.gmra.mxu0 %vm190_vm1, %v448_v15 }
 0x263   :  { %815 = vmatprep.mubr.msk.f32.mxu0 %vm885_vm0, %v884_v8 }
 0x266   :  { %816 = vmatmul.mubr.msk.f32.gmra.mxu0 %vm190_vm1, %v449_v16 }
 0x267   :  { %818 = vmatprep.mubr.msk.f32.mxu0 %vm885_vm0, %v884_v8 }
 0x26a   :  { %819 = vmatmul.mubr.msk.f32.gmra.mxu0 %vm190_vm1, %v450_v17 }
 0x31a   :  { %v562_v18 = vpop.f32.mrf.mxu0 }
 0x31b   :  { %v563_v41 = vadd.f32 %v562_v18, %v459_v40 }
 0x31c   :  { %v808_v19 = vpop.f32.mrf.mxu0 }
 0x31d   :  { %v586_v44 = vmax.f32 %v563_v41, 0.0 }
 0x31e   :  { %v567_v20 = vpop.f32.mrf.mxu0 }
 0x31f   :  { %v568_v38 = vadd.f32 %v567_v20, %v464_v37 }
 0x320   :  { %v811_v21 = vpop.f32.mrf.mxu0 }
 0x321   :  { %v587_v43 = vmax.f32 %v568_v38, 0.0 }
 0x322   :  { %v572_v22 = vpop.f32.mrf.mxu0 }
 0x323   :  { %v573_v34 = vadd.f32 %v572_v22, %v469_v28 }
 0x324   :  { %v814_v24 = vpop.f32.mrf.mxu0 }
 0x325   :  { %v588_v42 = vmax.f32 %v573_v34, 0.0 }
 0x326   :  { %v577_v25 = vpop.f32.mrf.mxu0 }
 0x327   :  { %v578_v30 = vadd.f32 %v577_v25, %v474_v26 }
 0x328   :  { %v817_v27 = vpop.f32.mrf.mxu0 }
 0x329   :  { %v589_v39 = vmax.f32 %v578_v30, 0.0 }
 0x32a   :  { %v582_v29 = vpop.f32.mrf.mxu0 }
 0x32b   :  { %v583_v32 = vadd.f32 %v582_v29, %v479_v23 }
 0x32c   :  { %v820_v33 = vpop.f32.mrf.mxu0 }
 0x32d   :  { %v590_v36 = vmax.f32 %v583_v32, 0.0 }
 0x32f   :  { %822 = vmatpush3.msra.mxu1 %v590_v36 }
 0x330   :  { %823 = vmatprep.subr.mxu1 %v884_v8 }
 0x331   :  { %824 = vmatpush3.msra.mxu1 %v589_v39 }
 0x332   :  { %825 = vmatprep.subr.mxu1 %v884_v8 }
 0x333   :  { %826 = vmatpush3.msra.mxu1 %v588_v42 }
 0x334   :  { %827 = vmatprep.subr.mxu1 %v884_v8 }
 0x335   :  { %828 = vmatpush3.msra.mxu1 %v587_v43 }
 0x336   :  { %829 = vmatprep.subr.mxu1 %v884_v8 }
 0x337   :  { %830 = vmatpush3.msra.mxu1 %v586_v44 }
 0x338   :  { %832 = vmatmul.mubr.msk.f32.vlgmr.msra.gmra.mxu1 %vm190_vm1, %v591_v45 }
 0x3f8   :  { %v671_v48 = vpop.f32.mrf.mxu1 }
 0x3f9   :  { %v672_v49 = vadd.f32 %v671_v48, %v601_v47 }
 0x3fa   :  { %v833_v50 = vpop.f32.mrf.mxu1 }
 0x3fb   :  { %v675_v51 = vmul.f32 0.5, %v672_v49 }
 0x3fd   :  { %858 = vtanh.f32 %v675_v51 }
 0x40a   :  { %v859_v52 = vpop.eup %858 }
 0x40b   :  { %v677_v53 = vmul.f32 0.5, %v859_v52 }
 0x40d   :  { %v678_v54 = vadd.f32 0.5, %v677_v53 }
 0x40f   :  { %679 = vst [vmem:[#allocation3] sm:$0x1] %v678_v54 }
 0x410   :  { %871 = shalt.err (!%p868_p4)
}
 0x411   :  { %689 = dma.vmem_to_hbm [thread:$0]  %s687_s26, 16, %s1171_s11, [#allocation4]  }
 0x412   :  { %880 = dma.done.wait [#allocation4], 16  }
 0x413   :  { %881 = vsyncadd [#allocation4], 4294967280 }
 0x414   :  { %693 = vsyncpa [#allocation4], 1 }

</bundles_post_ra>
